<compile_context>
chip_gen: v7x
topology: tpu7x:2x2x1
jax: 0.10.0
libtpu: 0.0.40
codegen_flags: <defaults>
</compile_context>

<pallas_src>
import jax
import jax.numpy as jnp
from jax.experimental import pallas as pl
from jax.experimental.pallas import tpu as pltpu

BN_EPS = 1e-5


# ---------------------------------------------------------------------------
# Kernel: layer-1 matmul accumulated over the K grid axis; on the last K step,
# bias+ReLU then layers 2 and 3 (all lane-dense, f32 MXU accumulation).
# ---------------------------------------------------------------------------
def mlp_kernel(x_ref, w1_ref, b1_ref, w2_ref, b2_ref, w3_ref, b3_ref, o_ref, acc_ref):
    k = pl.program_id(1)
    nk = pl.num_programs(1)

    @pl.when(k == 0)
    def _():
        acc_ref[...] = jnp.zeros_like(acc_ref)

    # ---- block 1: (Linear + folded BN), K-tiled reduction into f32 accumulator ----
    acc_ref[...] += jnp.dot(x_ref[...], w1_ref[...], preferred_element_type=jnp.float32)

    @pl.when(k == nk - 1)
    def _():
        # ---- block 1 epilogue: bias + ReLU, store intermediate in compute dtype ----
        h = jnp.maximum(acc_ref[...] + b1_ref[...], 0.0).astype(w2_ref.dtype)
        # ---- block 2: (Linear + folded BN) -> ReLU ----
        h = jnp.dot(h, w2_ref[...], preferred_element_type=jnp.float32)
        h = jnp.maximum(h + b2_ref[...], 0.0).astype(w3_ref.dtype)
        # ---- output head: Linear ----
        out = jnp.dot(h, w3_ref[...], preferred_element_type=jnp.float32)
        o_ref[...] = (out + b3_ref[...]).astype(o_ref.dtype)


# ---------------------------------------------------------------------------
# Helpers
# ---------------------------------------------------------------------------
def _round_up(n, m):
    return ((n + m - 1) // m) * m


def _pad2(a, rows, cols):
    return jnp.pad(a, ((0, rows - a.shape[0]), (0, cols - a.shape[1])))


def _vmem_capacity_bytes():
    try:
        return int(pltpu.get_tpu_info().vmem_capacity_bytes)
    except Exception:
        return 64 * 1024 * 1024  # conservative fallback (v7x per-TC VMEM)


def _vmem_bytes_estimate(bb, tk, H1p, H2p, Cp, nk, w_bytes, out_bytes):
    x_tile = 2 * bb * tk * w_bytes                        # double-buffered x tile
    o_tile = 2 * bb * Cp * out_bytes                      # double-buffered out tile
    w1_tile = (2 if nk > 1 else 1) * tk * H1p * w_bytes   # Buffered(1) iff grid-invariant
    w_rest = (H1p * H2p + H2p * Cp) * w_bytes             # Buffered(1): single copy each
    biases = (H1p + H2p + Cp) * 4                         # f32, Buffered(1)
    acc = bb * H1p * 4                                    # f32 accumulator scratch
    interm = bb * (H1p + H2p + Cp) * 4                    # in-kernel temporaries (upper bound)
    headroom = 2 << 20                                    # compiler scratch / semaphores
    return x_tile + o_tile + w1_tile + w_rest + biases + acc + interm + headroom


def _const_spec(shape):
    """Whole-array block, grid-invariant; single VMEM buffer (fetched once)."""
    idx = lambda i, k: (0,) * len(shape)
    try:
        return pl.BlockSpec(shape, idx, pipeline_mode=pl.Buffered(1))
    except TypeError:  # older jax without pipeline_mode kwarg
        return pl.BlockSpec(shape, idx)


# ---------------------------------------------------------------------------
# Wrapper: flatten, fold BN, pad to lane-dense shapes, tile batch (+ K if needed).
# ---------------------------------------------------------------------------
def mlp_forward(x, params, *, block_b=512, block_k=None,
                compute_dtype=jnp.bfloat16, out_dtype=jnp.float32):
    """x: (B, ...) — flattened to (B, input_size). Returns (B, n_classes) logits."""
    B = x.shape[0]
    x2d = x.reshape(B, -1).astype(jnp.float32)  # same as torch .view(batch, -1)
    F = x2d.shape[1]

    (w1, b1, g1, be1, m1, v1,
     w2, b2, g2, be2, m2, v2,
     w3, b3) = params

    H1, H2, C = w1.shape[1], w2.shape[1], w3.shape[1]

    # ---- fold eval-mode BatchNorm into the preceding Linear (host-side, once, in f32) ----
    s1 = g1 * jax.lax.rsqrt(v1 + BN_EPS)          # (1, H1)
    w1f = w1 * s1
    b1f = (b1 - m1) * s1 + be1
    s2 = g2 * jax.lax.rsqrt(v2 + BN_EPS)          # (1, H2)
    w2f = w2 * s2
    b2f = (b2 - m2) * s2 + be2

    # ---- lane-dense padding: all feature dims -> multiples of 128 ----
    H1p = _round_up(H1, 128)
    H2p = _round_up(H2, 128)
    Cp = _round_up(C, 128)
    Fp0 = _round_up(F, 128)

    w_bytes = jnp.dtype(compute_dtype).itemsize
    out_bytes = jnp.dtype(out_dtype).itemsize

    capacity = _vmem_capacity_bytes()
    budget = int(0.80 * capacity)

    # ---- batch tiling: balanced tiles, 16-row aligned (bf16 sublane packing) ----
    min_tiles = 2 if B >= 256 else 1              # give both v7x TensorCores work
    n_tiles = max(-(-B // block_b), min_tiles)
    bb = _round_up(-(-B // n_tiles), 16)

    # ---- K tiling of the first layer: only when the working set exceeds the budget ----
    tk = Fp0 if block_k is None else min(_round_up(block_k, 128), Fp0)

    def est(bb_, tk_):
        nk_ = -(-Fp0 // tk_)
        return _vmem_bytes_estimate(bb_, tk_, H1p, H2p, Cp, nk_, w_bytes, out_bytes)

    # shrink the K tile first (keeps batch parallelism), then the batch tile
    while est(bb, tk) > budget and tk > 128:
        tk = _round_up(max(128, tk // 2), 128)
    while est(bb, tk) > budget and bb > 16:
        bb = _round_up(max(16, bb // 2), 16)

    nk = -(-Fp0 // tk)
    Fp = nk * tk
    Bp = _round_up(B, bb)
    num_b = Bp // bb

    # ---- pad & cast operands ----
    xp = _pad2(x2d, Bp, Fp).astype(compute_dtype)
    w1p = _pad2(w1f, Fp, H1p).astype(compute_dtype)
    b1p = _pad2(b1f, 1, H1p).astype(jnp.float32)
    w2p = _pad2(w2f, H1p, H2p).astype(compute_dtype)
    b2p = _pad2(b2f, 1, H2p).astype(jnp.float32)
    w3p = _pad2(w3, H2p, Cp).astype(compute_dtype)
    b3p = _pad2(b3, 1, Cp).astype(jnp.float32)

    # ---- specs ----
    x_spec = pl.BlockSpec((bb, tk), lambda i, k: (i, k))
    if nk == 1:
        w1_spec = _const_spec((tk, H1p))                       # grid-invariant: 1 buffer
    else:
        w1_spec = pl.BlockSpec((tk, H1p), lambda i, k: (k, 0))  # K-varying: keep 2 buffers
    in_specs = [
        x_spec,
        w1_spec, _const_spec((1, H1p)),
        _const_spec((H1p, H2p)), _const_spec((1, H2p)),
        _const_spec((H2p, Cp)), _const_spec((1, Cp)),
    ]
    out_spec = pl.BlockSpec((bb, Cp), lambda i, k: (i, 0))

    est_bytes = est(bb, tk)
    vmem_limit = int(min(0.85 * capacity, max(int(1.25 * est_bytes), 32 << 20)))
    vmem_limit = max(vmem_limit, min(est_bytes, capacity))

    flops = 2 * Bp * (Fp * H1p + H1p * H2p + H2p * Cp)
    bytes_accessed = (Bp * Fp * w_bytes
                      + (Fp * H1p + H1p * H2p + H2p * Cp) * w_bytes
                      + (H1p + H2p + Cp) * 4
                      + Bp * Cp * out_bytes)
    cost = pl.CostEstimate(flops=flops, transcendentals=0, bytes_accessed=bytes_accessed)

    out_padded = pl.pallas_call(
        mlp_kernel,
        out_shape=jax.ShapeDtypeStruct((Bp, Cp), out_dtype),
        grid_spec=pltpu.PrefetchScalarGridSpec(
            num_scalar_prefetch=0,
            grid=(num_b, nk),
            in_specs=in_specs,
            out_specs=out_spec,
            scratch_shapes=[pltpu.VMEM((bb, H1p), jnp.float32)],
        ),
        compiler_params=pltpu.CompilerParams(
            dimension_semantics=("parallel", "arbitrary"),
            vmem_limit_bytes=vmem_limit,
        ),
        cost_estimate=cost,
    )(xp, w1p, b1p, w2p, b2p, w3p, b3p)

    return out_padded[:B, :C].astype(jnp.float32)


# ---------------------------------------------------------------------------
# Deterministic synthetic parameters (Linear weights stored as (in, out)).
# ---------------------------------------------------------------------------
def init_params(key, input_size, hidden_sizes, n_classes):
    dims = [input_size] + list(hidden_sizes) + [n_classes]
    keys = jax.random.split(key, 16)
    ki = iter(range(16))

    def lin(kin, kout, in_d, out_d):
        w = jax.random.normal(kin, (in_d, out_d), jnp.float32) * (1.0 / jnp.sqrt(in_d))
        b = jax.random.normal(kout, (1, out_d), jnp.float32) * 0.01
        return w, b

    def bn(k, d):
        k1, k2, k3, k4 = jax.random.split(k, 4)
        gamma = 1.0 + 0.1 * jax.random.normal(k1, (1, d), jnp.float32)
        beta = 0.1 * jax.random.normal(k2, (1, d), jnp.float32)
        rmean = 0.1 * jax.random.normal(k3, (1, d), jnp.float32)
        rvar = 1.0 + 0.1 * jax.random.uniform(k4, (1, d), jnp.float32)
        return gamma, beta, rmean, rvar

    w1, b1 = lin(keys[next(ki)], keys[next(ki)], dims[0], dims[1])
    g1, be1, m1, v1 = bn(keys[next(ki)], dims[1])
    w2, b2 = lin(keys[next(ki)], keys[next(ki)], dims[1], dims[2])
    g2, be2, m2, v2 = bn(keys[next(ki)], dims[2])
    w3, b3 = lin(keys[next(ki)], keys[next(ki)], dims[2], dims[3])

    return (w1, b1, g1, be1, m1, v1,
            w2, b2, g2, be2, m2, v2,
            w3, b3)


def mlp_reference(x, params):
    """Pure-JAX f32 reference mirroring the PyTorch eval-mode forward."""
    (w1, b1, g1, be1, m1, v1,
     w2, b2, g2, be2, m2, v2,
     w3, b3) = params
    h = x.reshape(x.shape[0], -1)
    h = h @ w1 + b1
    h = (h - m1) / jnp.sqrt(v1 + BN_EPS) * g1 + be1
    h = jnp.maximum(h, 0.0)
    h = h @ w2 + b2
    h = (h - m2) / jnp.sqrt(v2 + BN_EPS) * g2 + be2
    h = jnp.maximum(h, 0.0)
    return h @ w3 + b3


if __name__ == "__main__":
    # Small shapes consistent with the module: input_size = C*H*W = 4*8*8 = 256,
    # hidden_sizes = [128, 64], n_classes = 10, batch = 8.
    B, C, H, W = 8, 4, 8, 8
    input_size = C * H * W
    hidden_sizes = [128, 64]
    n_classes = 10

    key = jax.random.PRNGKey(0)
    kx, kp = jax.random.split(key)
    x = jax.random.normal(kx, (B, C, H, W), jnp.float32)   # NCHW, flattened in wrapper
    params = init_params(kp, input_size, hidden_sizes, n_classes)

    ref = mlp_reference(x, params)

    # f32 compute path (single K step): tight check against the eval-mode reference.
    out_f32 = jax.block_until_ready(mlp_forward(x, params, compute_dtype=jnp.float32))
    assert out_f32.shape == (B, n_classes)
    assert jnp.allclose(out_f32, ref, atol=1e-3, rtol=1e-3), "f32 Pallas output mismatch"

    # f32 compute path with the K-axis reduction forced on (nk = 2): tight check.
    out_kt = jax.block_until_ready(
        mlp_forward(x, params, compute_dtype=jnp.float32, block_k=128))
    assert out_kt.shape == (B, n_classes)
    assert jnp.allclose(out_kt, ref, atol=1e-3, rtol=1e-3), "K-tiled Pallas output mismatch"

    # bf16-weight path (default, MXU-friendly): loose check.
    out_bf16 = jax.block_until_ready(mlp_forward(x, params))
    assert out_bf16.shape == (B, n_classes)
    assert jnp.allclose(out_bf16, ref, atol=5e-2, rtol=5e-2), "bf16 Pallas output mismatch"

    print("KERNEL_OK")
</pallas_src>

<mosaic_0001>
module attributes {stable_mosaic.version = 11 : i64} {
  func.func @mlp_kernel(%arg0: i32, %arg1: i32, %arg2: memref<16x256xf32, #tpu.memory_space<vmem>>, %arg3: memref<256x128xf32, #tpu.memory_space<vmem>>, %arg4: memref<1x128xf32, #tpu.memory_space<vmem>>, %arg5: memref<128x128xf32, #tpu.memory_space<vmem>>, %arg6: memref<1x128xf32, #tpu.memory_space<vmem>>, %arg7: memref<128x128xf32, #tpu.memory_space<vmem>>, %arg8: memref<1x128xf32, #tpu.memory_space<vmem>>, %arg9: memref<16x128xf32, #tpu.memory_space<vmem>>, %arg10: memref<16x128xf32, #tpu.memory_space<vmem>>) attributes {dimension_semantics = [#tpu.dimension_semantics<parallel>, #tpu.dimension_semantics<arbitrary>], iteration_bounds = array<i64: 1, 1>, scalar_prefetch = 0 : i64, scratch_operands = 1 : i64, tpu.core_type = #tpu.core_type<tc>, window_params = [{transform_indices = @transform_0, window_bounds = array<i64: 16, 256>}, {pipeline_mode = #tpu.pipeline_mode<synchronous>, transform_indices = @transform_1, window_bounds = array<i64: 256, 128>}, {pipeline_mode = #tpu.pipeline_mode<synchronous>, transform_indices = @transform_2, window_bounds = array<i64: 1, 128>}, {pipeline_mode = #tpu.pipeline_mode<synchronous>, transform_indices = @transform_3, window_bounds = array<i64: 128, 128>}, {pipeline_mode = #tpu.pipeline_mode<synchronous>, transform_indices = @transform_4, window_bounds = array<i64: 1, 128>}, {pipeline_mode = #tpu.pipeline_mode<synchronous>, transform_indices = @transform_5, window_bounds = array<i64: 128, 128>}, {pipeline_mode = #tpu.pipeline_mode<synchronous>, transform_indices = @transform_6, window_bounds = array<i64: 1, 128>}, {transform_indices = @transform_7, window_bounds = array<i64: 16, 128>}]} {
    %c0_i32 = arith.constant 0 : i32
    %0 = arith.cmpi eq, %arg1, %c0_i32 : i32
    %1 = arith.extui %0 : i1 to i32
    %c0_i32_0 = arith.constant 0 : i32
    %2 = arith.cmpi ne, %1, %c0_i32_0 : i32
    scf.if %2 {
      %cst_10 = arith.constant 0.000000e+00 : f32
      %12 = vector.broadcast %cst_10 : f32 to vector<16x128xf32>
      %c0_11 = arith.constant 0 : index
      %c0_12 = arith.constant 0 : index
      %13 = vector.load %arg10[%c0_11, %c0_12] : memref<16x128xf32, #tpu.memory_space<vmem>>, vector<16x128xf32>
      tpu.vector_store %arg10[%c0_11, %c0_12], %12 {strides = array<i32>} : memref<16x128xf32, #tpu.memory_space<vmem>>, vector<16x128xf32>,
    } else {
    }
    %c0 = arith.constant 0 : index
    %c0_1 = arith.constant 0 : index
    %3 = vector.load %arg10[%c0, %c0_1] : memref<16x128xf32, #tpu.memory_space<vmem>>, vector<16x128xf32>
    %c0_2 = arith.constant 0 : index
    %c0_3 = arith.constant 0 : index
    %4 = vector.load %arg2[%c0_2, %c0_3] : memref<16x256xf32, #tpu.memory_space<vmem>>, vector<16x256xf32>
    %c0_4 = arith.constant 0 : index
    %c0_5 = arith.constant 0 : index
    %5 = vector.load %arg3[%c0_4, %c0_5] : memref<256x128xf32, #tpu.memory_space<vmem>>, vector<256x128xf32>
    %cst = arith.constant dense<0.000000e+00> : vector<16x128xf32>
    %6 = tpu.matmul %4, %5, %cst {dimension_numbers = #tpu.dot_dimension_numbers<[1], [0], [0], [1], [0, 0, 1, 1], [], []>} : vector<16x256xf32>, vector<256x128xf32>, vector<16x128xf32> -> vector<16x128xf32>
    %7 = arith.addf %3, %6 : vector<16x128xf32>
    %c0_6 = arith.constant 0 : index
    %c0_7 = arith.constant 0 : index
    %8 = vector.load %arg10[%c0_6, %c0_7] : memref<16x128xf32, #tpu.memory_space<vmem>>, vector<16x128xf32>
    tpu.vector_store %arg10[%c0_6, %c0_7], %7 {strides = array<i32>} : memref<16x128xf32, #tpu.memory_space<vmem>>, vector<16x128xf32>,
    %c0_i32_8 = arith.constant 0 : i32
    %9 = arith.cmpi eq, %arg1, %c0_i32_8 : i32
    %10 = arith.extui %9 : i1 to i32
    %c0_i32_9 = arith.constant 0 : i32
    %11 = arith.cmpi ne, %10, %c0_i32_9 : i32
    scf.if %11 {
      %c0_10 = arith.constant 0 : index
      %c0_11 = arith.constant 0 : index
      %12 = vector.load %arg10[%c0_10, %c0_11] : memref<16x128xf32, #tpu.memory_space<vmem>>, vector<16x128xf32>
      %c0_12 = arith.constant 0 : index
      %c0_13 = arith.constant 0 : index
      %13 = vector.load %arg4[%c0_12, %c0_13] : memref<1x128xf32, #tpu.memory_space<vmem>>, vector<1x128xf32>
      %14 = vector.broadcast %13 : vector<1x128xf32> to vector<16x128xf32>
      %15 = arith.addf %12, %14 : vector<16x128xf32>
      %cst_14 = arith.constant 0.000000e+00 : f32
      %16 = vector.broadcast %cst_14 : f32 to vector<16x128xf32>
      %17 = arith.maximumf %15, %16 : vector<16x128xf32>
      %c0_15 = arith.constant 0 : index
      %c0_16 = arith.constant 0 : index
      %18 = vector.load %arg5[%c0_15, %c0_16] : memref<128x128xf32, #tpu.memory_space<vmem>>, vector<128x128xf32>
      %cst_17 = arith.constant dense<0.000000e+00> : vector<16x128xf32>
      %19 = tpu.matmul %17, %18, %cst_17 {dimension_numbers = #tpu.dot_dimension_numbers<[1], [0], [0], [1], [0, 0, 1, 1], [], []>} : vector<16x128xf32>, vector<128x128xf32>, vector<16x128xf32> -> vector<16x128xf32>
      %c0_18 = arith.constant 0 : index
      %c0_19 = arith.constant 0 : index
      %20 = vector.load %arg6[%c0_18, %c0_19] : memref<1x128xf32, #tpu.memory_space<vmem>>, vector<1x128xf32>
      %21 = vector.broadcast %20 : vector<1x128xf32> to vector<16x128xf32>
      %22 = arith.addf %19, %21 : vector<16x128xf32>
      %cst_20 = arith.constant 0.000000e+00 : f32
      %23 = vector.broadcast %cst_20 : f32 to vector<16x128xf32>
      %24 = arith.maximumf %22, %23 : vector<16x128xf32>
      %c0_21 = arith.constant 0 : index
      %c0_22 = arith.constant 0 : index
      %25 = vector.load %arg7[%c0_21, %c0_22] : memref<128x128xf32, #tpu.memory_space<vmem>>, vector<128x128xf32>
      %cst_23 = arith.constant dense<0.000000e+00> : vector<16x128xf32>
      %26 = tpu.matmul %24, %25, %cst_23 {dimension_numbers = #tpu.dot_dimension_numbers<[1], [0], [0], [1], [0, 0, 1, 1], [], []>} : vector<16x128xf32>, vector<128x128xf32>, vector<16x128xf32> -> vector<16x128xf32>
      %c0_24 = arith.constant 0 : index
      %c0_25 = arith.constant 0 : index
      %27 = vector.load %arg8[%c0_24, %c0_25] : memref<1x128xf32, #tpu.memory_space<vmem>>, vector<1x128xf32>
      %28 = vector.broadcast %27 : vector<1x128xf32> to vector<16x128xf32>
      %29 = arith.addf %26, %28 : vector<16x128xf32>
      %c0_26 = arith.constant 0 : index
      %c0_27 = arith.constant 0 : index
      %30 = vector.load %arg9[%c0_26, %c0_27] : memref<16x128xf32, #tpu.memory_space<vmem>>, vector<16x128xf32>
      tpu.vector_store %arg9[%c0_26, %c0_27], %29 {strides = array<i32>} : memref<16x128xf32, #tpu.memory_space<vmem>>, vector<16x128xf32>,
    } else {
    }
    return
  }
  func.func @transform_0(%arg0: i32, %arg1: i32) -> (i32, i32) {
    %c0_i32 = arith.constant 0 : i32
    return %arg0, %arg1 : i32, i32
  }
  func.func @transform_1(%arg0: i32, %arg1: i32) -> (i32, i32) {
    %c0_i32 = arith.constant 0 : i32
    %c0_i32_0 = arith.constant 0 : i32
    %c0_i32_1 = arith.constant 0 : i32
    return %c0_i32, %c0_i32_0 : i32, i32
  }
  func.func @transform_2(%arg0: i32, %arg1: i32) -> (i32, i32) {
    %c0_i32 = arith.constant 0 : i32
    %c0_i32_0 = arith.constant 0 : i32
    %c0_i32_1 = arith.constant 0 : i32
    return %c0_i32, %c0_i32_0 : i32, i32
  }
  func.func @transform_3(%arg0: i32, %arg1: i32) -> (i32, i32) {
    %c0_i32 = arith.constant 0 : i32
    %c0_i32_0 = arith.constant 0 : i32
    %c0_i32_1 = arith.constant 0 : i32
    return %c0_i32, %c0_i32_0 : i32, i32
  }
  func.func @transform_4(%arg0: i32, %arg1: i32) -> (i32, i32) {
    %c0_i32 = arith.constant 0 : i32
    %c0_i32_0 = arith.constant 0 : i32
    %c0_i32_1 = arith.constant 0 : i32
    return %c0_i32, %c0_i32_0 : i32, i32
  }
  func.func @transform_5(%arg0: i32, %arg1: i32) -> (i32, i32) {
    %c0_i32 = arith.constant 0 : i32
    %c0_i32_0 = arith.constant 0 : i32
    %c0_i32_1 = arith.constant 0 : i32
    return %c0_i32, %c0_i32_0 : i32, i32
  }
  func.func @transform_6(%arg0: i32, %arg1: i32) -> (i32, i32) {
    %c0_i32 = arith.constant 0 : i32
    %c0_i32_0 = arith.constant 0 : i32
    %c0_i32_1 = arith.constant 0 : i32
    return %c0_i32, %c0_i32_0 : i32, i32
  }
  func.func @transform_7(%arg0: i32, %arg1: i32) -> (i32, i32) {
    %c0_i32 = arith.constant 0 : i32
    %c0_i32_0 = arith.constant 0 : i32
    return %arg0, %c0_i32 : i32, i32
  }
}

</mosaic_0001>

<bundles_post_ra>
// kernel: tpu_custom_call.1
= control target key start
LH: loop header
LB: loop body
LE: loop exit
PB: predicated region body
PF: predicated region fallthrough
CT: control target
= control target key end

     0   :  { %12 = vsyncpa [#allocation4], 0  ;;  %s947_s0 = inlined_call_operand.hbm [shape: f32[16,256], index: 0, kind: input, shape index: {}]   ;;  %s948_s1 = inlined_call_operand.hbm [shape: f32[256,128], index: 1, kind: input, shape index: {}]   ;;  %s949_s2 = inlined_call_operand.vmem [shape: f32[1,128], index: 2, kind: input, shape index: {}]   ;;  %s950_s3 = inlined_call_operand.hbm [shape: f32[128,128], index: 3, kind: input, shape index: {}]   ;;  %s951_s4 = inlined_call_operand.vmem [shape: f32[1,128], index: 4, kind: input, shape index: {}]   ;;  %s952_s5 = inlined_call_operand.hbm [shape: f32[128,128], index: 5, kind: input, shape index: {}]   ;;  %s953_s6 = inlined_call_operand.vmem [shape: f32[1,128], index: 6, kind: input, shape index: {}]   ;;  %s954_s7 = inlined_call_operand.hbm [shape: f32[16,128], index: 7, kind: output, shape index: {}]  }
   0x1   :  { %13 = vsyncpa [#allocation7], 0 }
   0x2   :  { %14 = vsyncpa [#allocation10], 0 }
   0x3   :  { %15 = vsyncpa [#allocation5], 0  ;;  %s810_s24 = smov [#allocation6]   ;;  %s692_s28 = scalar_lea.hbm %s948_s1, 4096 }
   0x4   :  { %s33_s25 = sshll.u32 %s810_s24, 4  ;;  %p693_p0 = scmp.ne.s32.totalorder %s948_s1, %s692_s28  ;;  %s34_s25 = int_to_ptr.vmem [resolvable:$true] %s33_s25 }
   0x5   :  { %p696_p1 = scmp.lt.u32.totalorder %s692_s28, %s948_s1 }
   0x7   :  { %p698_p2 = pnand %p696_p1, %p693_p0 }
   0x9   :  { %701 = shalt.err (!%p698_p2)
}
   0xa   :  { %s702_s10 = scalar_lea.vmem %s34_s25, 4096  ;;  %p707_p4 = scmp.lt.s32.totalorder %s34_s25, %s34_s25 }
   0xb   :  { %p703_p3 = scmp.ne.s32.totalorder %s34_s25, %s702_s10  ;;  %p708_p5 = scmp.lt.s32.totalorder %s702_s10, %s702_s10 }
   0xd   :  { %p709_p6 = por %p708_p5, %p707_p4 }
   0xf   :  { %p710_p7 = pnand %p709_p6, %p703_p3 }
  0x11   :  { %713 = shalt.err (!%p710_p7)
}
  0x12   :  { %s811_s11 = smov 128   ;;  %s812_s12 = smov 8  }
  0x13   :  { %39 = dma.hbm_to_vmem [thread:$0]  %s948_s1, 4096, %s34_s25, [#allocation7], %s811_s11, %s811_s11, %s812_s12  }
  0x14   :  { %s813_s15 = smov [#allocation3]   ;;  %s714_s19 = scalar_lea.hbm %s947_s0, 512 }
  0x15   :  { %s21_s16 = sshll.u32 %s813_s15, 4  ;;  %p715_p8 = scmp.ne.s32.totalorder %s947_s0, %s714_s19  ;;  %s22_s16 = int_to_ptr.vmem [resolvable:$true] %s21_s16 }
  0x16   :  { %p718_p9 = scmp.lt.u32.totalorder %s714_s19, %s947_s0 }
  0x18   :  { %p720_p10 = pnand %p718_p9, %p715_p8 }
  0x1a   :  { %723 = shalt.err (!%p720_p10)
}
  0x1b   :  { %s724_s24 = scalar_lea.vmem %s22_s16, 512  ;;  %p729_p12 = scmp.lt.s32.totalorder %s22_s16, %s22_s16 }
  0x1c   :  { %p725_p11 = scmp.ne.s32.totalorder %s22_s16, %s724_s24  ;;  %p730_p13 = scmp.lt.s32.totalorder %s724_s24, %s724_s24 }
  0x1e   :  { %p731_p0 = por %p730_p13, %p729_p12 }
  0x20   :  { %p732_p1 = pnand %p731_p0, %p725_p11 }
  0x22   :  { %735 = shalt.err (!%p732_p1)
}
  0x23   :  { %s814_s1 = smov 256   ;;  %s815_s25 = smov 16  }
  0x24   :  { %27 = dma.hbm_to_vmem [thread:$0]  %s947_s0, 512, %s22_s16, [#allocation4], %s814_s1, %s814_s1, %s815_s25  }
  0x25   :  { %s816_s28 = smov [#allocation8]   ;;  %s817_s30 = smov [#allocation9]  }
  0x26   :  { %s47_s29 = sshll.u32 %s816_s28, 4  ;;  %s61_s8 = sshll.u32 %s817_s30, 4  ;;  %s48_s29 = int_to_ptr.vmem [resolvable:$true] %s47_s29  ;;  %s886_s8 = int_to_ptr.vmem [resolvable:$true] %s61_s8 }
  0x27   :  { %s736_s13 = scalar_lea.hbm %s950_s3, 2048 }
  0x28   :  { %p737_p2 = scmp.ne.s32.totalorder %s950_s3, %s736_s13  ;;  %p740_p3 = scmp.lt.u32.totalorder %s736_s13, %s950_s3 }
  0x2a   :  { %p742_p4 = pnand %p740_p3, %p737_p2 }
  0x2c   :  { %745 = shalt.err (!%p742_p4)
}
  0x2d   :  { %s746_s0 = scalar_lea.vmem %s48_s29, 2048  ;;  %p751_p6 = scmp.lt.s32.totalorder %s48_s29, %s48_s29 }
  0x2e   :  { %p747_p5 = scmp.ne.s32.totalorder %s48_s29, %s746_s0  ;;  %p752_p7 = scmp.lt.s32.totalorder %s746_s0, %s746_s0 }
  0x30   :  { %p753_p8 = por %p752_p7, %p751_p6 }
  0x32   :  { %p754_p9 = pnand %p753_p8, %p747_p5 }
  0x34   :  { %757 = shalt.err (!%p754_p9)
}
  0x35   :  { %53 = dma.hbm_to_vmem [thread:$0]  %s950_s3, 2048, %s48_s29, [#allocation7], %s811_s11, %s811_s11, %s812_s12  }
  0x36   :  { %s758_s22 = scalar_lea.hbm %s952_s5, 2048 }
  0x37   :  { %p759_p10 = scmp.ne.s32.totalorder %s952_s5, %s758_s22  ;;  %p762_p11 = scmp.lt.u32.totalorder %s758_s22, %s952_s5 }
  0x39   :  { %p764_p12 = pnand %p762_p11, %p759_p10 }
  0x3b   :  { %767 = shalt.err (!%p764_p12)
}
  0x3c   :  { %s768_s26 = scalar_lea.vmem %s886_s8, 2048  ;;  %p773_p0 = scmp.lt.s32.totalorder %s886_s8, %s886_s8 }
  0x3d   :  { %p769_p13 = scmp.ne.s32.totalorder %s886_s8, %s768_s26  ;;  %p774_p1 = scmp.lt.s32.totalorder %s768_s26, %s768_s26 }
  0x3f   :  { %p775_p2 = por %p774_p1, %p773_p0 }
  0x41   :  { %p776_p3 = pnand %p775_p2, %p769_p13 }
  0x43   :  { %779 = shalt.err (!%p776_p3)
}
  0x44   :  { %67 = dma.hbm_to_vmem [thread:$0]  %s952_s5, 2048, %s886_s8, [#allocation10], %s811_s11, %s811_s11, %s812_s12  }
  0x45   :  { %802 = dma.done.wait [#allocation4], 512  }
  0x46   :  { %803 = vsyncadd [#allocation4], 4294966784 }
  0x47   :  { %804 = dma.done.wait [#allocation7], 6144  }
  0x48   :  { %805 = vsyncadd [#allocation7], 4294961152 }
  0x49   :  { %806 = dma.done.wait [#allocation10], 2048  }
  0x4a   :  { %807 = vsyncadd [#allocation10], 4294965248  ;;  %v110_v0 = vld [vmem:[#allocation6 + $0x80] sm:$0xff]  ;;  %v111_v1 = vld [vmem:[#allocation6 + $0x88] sm:$0xff]  ;;  %s818_s9 = smov [#allocation11]  }
  0x4b   :  { %v94_v2 = vld [vmem:[#allocation6] sm:$0xff]  ;;  %v587_v3 = vpack.c.bf16 %v111_v1, %v110_v0  ;;  %v95_v4 = vld [vmem:[#allocation6 + $0x8] sm:$0xff]  ;;  %v112_v5 = vld [vmem:[#allocation6 + $0x90] sm:$0xff]  ;;  %s426_s10 = sshll.u32 %s818_s9, 4  ;;  %s427_s10 = int_to_ptr.vmem [resolvable:$true] %s426_s10 }
  0x4c   :  { %v113_v6 = vld [vmem:[#allocation6 + $0x98] sm:$0xff]  ;;  %v589_v7 = vpack.c.bf16 %v95_v4, %v94_v2  ;;  %v96_v9 = vld [vmem:[#allocation6 + $0x10] sm:$0xff]  ;;  %v114_v11 = vld [vmem:[#allocation6 + $0xa0] sm:$0xff]  ;;  %p785_p5 = scmp.lt.s32.totalorder %s427_s10, %s427_s10 }
  0x4d   :  { %v591_v8 = vpack.c.bf16 %v113_v6, %v112_v5  ;;  %v97_v10 = vld [vmem:[#allocation6 + $0x18] sm:$0xff]  ;;  %588 = vmatprep.subr.bf16.mxu0 %v587_v3  ;;  %v115_v12 = vld [vmem:[#allocation6 + $0xa8] sm:$0xff]  ;;  %v98_v15 = vld [vmem:[#allocation6 + $0x20] sm:$0xff] }
  0x4e   :  { %590 = vmatpush3.bf16.msra.mxu0 %v589_v7  ;;  %v593_v13 = vpack.c.bf16 %v97_v10, %v96_v9  ;;  %v595_v14 = vpack.c.bf16 %v115_v12, %v114_v11  ;;  %v99_v16 = vld [vmem:[#allocation6 + $0x28] sm:$0xff]  ;;  %v116_v17 = vld [vmem:[#allocation6 + $0xb0] sm:$0xff]  ;;  %v117_v18 = vld [vmem:[#allocation6 + $0xb8] sm:$0xff] }
  0x4f   :  { %592 = vmatprep.subr.bf16.mxu0 %v591_v8  ;;  %v597_v19 = vpack.c.bf16 %v99_v16, %v98_v15  ;;  %v599_v20 = vpack.c.bf16 %v117_v18, %v116_v17  ;;  %v100_v21 = vld [vmem:[#allocation6 + $0x30] sm:$0xff]  ;;  %v101_v22 = vld [vmem:[#allocation6 + $0x38] sm:$0xff]  ;;  %v118_v23 = vld [vmem:[#allocation6 + $0xc0] sm:$0xff] }
  0x50   :  { %v119_v24 = vld [vmem:[#allocation6 + $0xc8] sm:$0xff]  ;;  %v102_v26 = vld [vmem:[#allocation6 + $0x40] sm:$0xff]  ;;  %v601_v27 = vpack.c.bf16 %v101_v22, %v100_v21  ;;  %v223_v30 = vld [vmem:[#allocation8 + $0x10] sm:$0xff] }
  0x51   :  { %v91_v25 = vld [vmem:[#allocation3 + $0x8] sm:$0xff]  ;;  %v221_v28 = vld [vmem:[#allocation8] sm:$0xff]  ;;  %v603_v31 = vpack.c.bf16 %v119_v24, %v118_v23  ;;  %v120_v33 = vld [vmem:[#allocation6 + $0xd0] sm:$0xff] }
  0x52   :  { %594 = vmatpush3.bf16.msra.mxu0 %v593_v13  ;;  %190 = vmatprep.mubr.f32.mxu0 %v91_v25  ;;  %v222_v29 = vld [vmem:[#allocation8 + $0x8] sm:$0xff]  ;;  %v224_v35 = vld [vmem:[#allocation8 + $0x18] sm:$0xff]  ;;  %v225_v38 = vld [vmem:[#allocation8 + $0x20] sm:$0xff] }
  0x53   :  { %596 = vmatprep.subr.bf16.mxu0 %v595_v14  ;;  %v103_v32 = vld [vmem:[#allocation6 + $0x48] sm:$0xff]  ;;  %v619_v34 = vpack.c.bf16 %v222_v29, %v221_v28  ;;  %v121_v36 = vld [vmem:[#allocation6 + $0xd8] sm:$0xff]  ;;  %v623_v37 = vpack.c.bf16 %v224_v35, %v223_v30  ;;  %v104_v42 = vld [vmem:[#allocation6 + $0x50] sm:$0xff] }
  0x54   :  { %v226_v39 = vld [vmem:[#allocation8 + $0x28] sm:$0xff]  ;;  %v605_v40 = vpack.c.bf16 %v103_v32, %v102_v26  ;;  %v607_v41 = vpack.c.bf16 %v121_v36, %v120_v33  ;;  %v105_v43 = vld [vmem:[#allocation6 + $0x58] sm:$0xff]  ;;  %v122_v44 = vld [vmem:[#allocation6 + $0xe0] sm:$0xff] }
  0x55   :  { %620 = vmatprep.subr.bf16.mxu1 %v619_v34  ;;  %v627_v45 = vpack.c.bf16 %v226_v39, %v225_v38  ;;  %v123_v46 = vld [vmem:[#allocation6 + $0xe8] sm:$0xff]  ;;  %v227_v47 = vld [vmem:[#allocation8 + $0x30] sm:$0xff]  ;;  %v228_v48 = vld [vmem:[#allocation8 + $0x38] sm:$0xff]  ;;  %v609_v49 = vpack.c.bf16 %v105_v43, %v104_v42 }
  0x56   :  { %598 = vmatpush3.bf16.msra.mxu0 %v597_v19  ;;  %622 = vmatpush3.bf16.msra.mxu1 %v619_v34  ;;  %v611_v50 = vpack.c.bf16 %v123_v46, %v122_v44  ;;  %v106_v51 = vld [vmem:[#allocation6 + $0x60] sm:$0xff]  ;;  %v107_v52 = vld [vmem:[#allocation6 + $0x68] sm:$0xff]  ;;  %v124_v53 = vld [vmem:[#allocation6 + $0xf0] sm:$0xff]  ;;  %v631_v54 = vpack.c.bf16 %v228_v48, %v227_v47 }
  0x57   :  { %600 = vmatprep.subr.bf16.mxu0 %v599_v20  ;;  %624 = vmatprep.subr.bf16.mxu1 %v623_v37  ;;  %v125_v55 = vld [vmem:[#allocation6 + $0xf8] sm:$0xff]  ;;  %v229_v56 = vld [vmem:[#allocation8 + $0x40] sm:$0xff]  ;;  %v230_v57 = vld [vmem:[#allocation8 + $0x48] sm:$0xff]  ;;  %v613_v58 = vpack.c.bf16 %v107_v52, %v106_v51 }
  0x58   :  { %v615_v59 = vpack.c.bf16 %v125_v55, %v124_v53  ;;  %v108_v60 = vld [vmem:[#allocation6 + $0x70] sm:$0xff]  ;;  %v109_v61 = vld [vmem:[#allocation6 + $0x78] sm:$0xff]  ;;  %v635_v62 = vpack.c.bf16 %v230_v57, %v229_v56  ;;  %v90_v0 = vld [vmem:[#allocation3] sm:$0xff] }
  0x59   :  { %v617_v63 = vpack.c.bf16 %v109_v61, %v108_v60  ;;  %v93_v1 = vld [vmem:[#allocation3 + $0x18] sm:$0xff]  ;;  %v92_v2 = vld [vmem:[#allocation3 + $0x10] sm:$0xff]  ;;  %v233_v6 = vld [vmem:[#allocation8 + $0x60] sm:$0xff] }
  0x5a   :  { %602 = vmatpush3.bf16.msra.mxu0 %v601_v27  ;;  %626 = vmatpush3.bf16.msra.mxu1 %v623_v37  ;;  %v231_v3 = vld [vmem:[#allocation8 + $0x50] sm:$0xff]  ;;  %v232_v4 = vld [vmem:[#allocation8 + $0x58] sm:$0xff]  ;;  %v234_v7 = vld [vmem:[#allocation8 + $0x68] sm:$0xff] }
  0x5b   :  { %604 = vmatprep.subr.bf16.mxu0 %v603_v31  ;;  %628 = vmatprep.subr.bf16.mxu1 %v627_v45  ;;  %v639_v5 = vpack.c.bf16 %v232_v4, %v231_v3  ;;  %v643_v8 = vpack.c.bf16 %v234_v7, %v233_v6  ;;  %v235_v9 = vld [vmem:[#allocation8 + $0x70] sm:$0xff]  ;;  %v236_v10 = vld [vmem:[#allocation8 + $0x78] sm:$0xff]  ;;  %v321_v12 = vld [vmem:[#allocation9] sm:$0xff] }
  0x5c   :  { %v647_v11 = vpack.c.bf16 %v236_v10, %v235_v9  ;;  %v322_v13 = vld [vmem:[#allocation9 + $0x8] sm:$0xff]  ;;  %v323_v14 = vld [vmem:[#allocation9 + $0x10] sm:$0xff]  ;;  %v324_v16 = vld [vmem:[#allocation9 + $0x18] sm:$0xff] }
  0x5d   :  { %v651_v15 = vpack.c.bf16 %v322_v13, %v321_v12  ;;  %v655_v17 = vpack.c.bf16 %v324_v16, %v323_v14  ;;  %v325_v18 = vld [vmem:[#allocation9 + $0x20] sm:$0xff]  ;;  %v326_v19 = vld [vmem:[#allocation9 + $0x28] sm:$0xff]  ;;  %v327_v21 = vld [vmem:[#allocation9 + $0x30] sm:$0xff] }
  0x5e   :  { %606 = vmatpush3.bf16.msra.mxu0 %v605_v40  ;;  %630 = vmatpush3.bf16.msra.mxu1 %v627_v45  ;;  %v659_v20 = vpack.c.bf16 %v326_v19, %v325_v18  ;;  %v328_v22 = vld [vmem:[#allocation9 + $0x38] sm:$0xff]  ;;  %v329_v24 = vld [vmem:[#allocation9 + $0x40] sm:$0xff]  ;;  %v330_v25 = vld [vmem:[#allocation9 + $0x48] sm:$0xff] }
  0x5f   :  { %608 = vmatprep.subr.bf16.mxu0 %v607_v41  ;;  %632 = vmatprep.subr.bf16.mxu1 %v631_v54  ;;  %v663_v23 = vpack.c.bf16 %v328_v22, %v327_v21  ;;  %v667_v26 = vpack.c.bf16 %v330_v25, %v329_v24  ;;  %v331_v27 = vld [vmem:[#allocation9 + $0x50] sm:$0xff]  ;;  %v332_v28 = vld [vmem:[#allocation9 + $0x58] sm:$0xff]  ;;  %v333_v30 = vld [vmem:[#allocation9 + $0x60] sm:$0xff] }
  0x60   :  { %v671_v29 = vpack.c.bf16 %v332_v28, %v331_v27  ;;  %v334_v31 = vld [vmem:[#allocation9 + $0x68] sm:$0xff]  ;;  %v440_v35 = vld [vmem:[%s949_s2] ss:$0 sm:$0xff]  ;;  %v335_v44 = vld [vmem:[#allocation9 + $0x70] sm:$0xff] }
  0x61   :  { %v675_v32 = vpack.c.bf16 %v334_v31, %v333_v30  ;;  %v336_v45 = vld [vmem:[#allocation9 + $0x78] sm:$0xff]  ;;  %v441_v47 = vld [vmem:[%s951_s4] ss:$0 sm:$0xff]  ;;  %s780_s4 = scalar_lea.vmem %s427_s10, 256 }
  0x62   :  { %610 = vmatpush3.bf16.msra.mxu0 %v609_v49  ;;  %634 = vmatpush3.bf16.msra.mxu1 %v631_v54  ;;  %v679_v46 = vpack.c.bf16 %v336_v45, %v335_v44  ;;  %v442_v54 = vld [vmem:[%s953_s6] ss:$0 sm:$0xff]  ;;  %p781_p4 = scmp.ne.s32.totalorder %s427_s10, %s780_s4  ;;  %p786_p6 = scmp.lt.s32.totalorder %s780_s4, %s780_s4 }
  0x63   :  { %612 = vmatprep.subr.bf16.mxu0 %v611_v50  ;;  %636 = vmatprep.subr.bf16.mxu1 %v635_v62 }
  0x64   :  { %p787_p7 = por %p786_p6, %p785_p5 }
  0x66   :  { %614 = vmatpush3.bf16.msra.mxu0 %v613_v58  ;;  %638 = vmatpush3.bf16.msra.mxu1 %v635_v62  ;;  %p788_p8 = pnand %p787_p7, %p781_p4 }
  0x67   :  { %616 = vmatprep.subr.bf16.mxu0 %v615_v59  ;;  %640 = vmatprep.subr.bf16.mxu1 %v639_v5 }
  0x6a   :  { %618 = vmatpush3.bf16.msra.mxu0 %v617_v63  ;;  %642 = vmatpush3.bf16.msra.mxu1 %v639_v5 }
  0x6b   :  { %644 = vmatprep.subr.bf16.mxu1 %v643_v8  ;;  %652 = vmatprep.subr.bf16.mxu0 %v651_v15 }
  0x6d   :  { %191 = vmatmul.mubr.f32.vlgmr.msra.gmra.mrb[0].mxu0 %v90_v0 }
  0x6e   :  { %195 = vmatprep.mubr.f32.mxu0 %v93_v1  ;;  %646 = vmatpush3.bf16.msra.mxu1 %v643_v8 }
  0x6f   :  { %648 = vmatprep.subr.bf16.mxu1 %v647_v11  ;;  %654 = vmatpush3.bf16.msra.mxu0 %v651_v15 }
  0x70   :  { %656 = vmatprep.subr.bf16.mxu0 %v655_v17 }
  0x71   :  { %196 = vmatmul.mubr.f32.gmra.mrb[2].mxu0 %v92_v2 }
  0x72   :  { %650 = vmatpush3.bf16.msra.mxu1 %v647_v11 }
  0x73   :  { %658 = vmatpush3.bf16.msra.mxu0 %v655_v17 }
  0x74   :  { %660 = vmatprep.subr.bf16.mxu0 %v659_v20 }
  0x77   :  { %662 = vmatpush3.bf16.msra.mxu0 %v659_v20 }
  0x78   :  { %664 = vmatprep.subr.bf16.mxu0 %v663_v23 }
  0x7b   :  { %666 = vmatpush3.bf16.msra.mxu0 %v663_v23 }
  0x7c   :  { %668 = vmatprep.subr.bf16.mxu0 %v667_v26 }
  0x7f   :  { %670 = vmatpush3.bf16.msra.mxu0 %v667_v26 }
  0x80   :  { %672 = vmatprep.subr.bf16.mxu0 %v671_v29 }
  0x83   :  { %674 = vmatpush3.bf16.msra.mxu0 %v671_v29 }
  0x84   :  { %676 = vmatprep.subr.bf16.mxu0 %v675_v32 }
  0x87   :  { %678 = vmatpush3.bf16.msra.mxu0 %v675_v32 }
  0x88   :  { %680 = vmatprep.subr.bf16.mxu0 %v679_v46 }
  0x8b   :  { %682 = vmatpush3.bf16.msra.mxu0 %v679_v46 }
 0x140   :  { %v475_v33 = vpop.f32.mrb[0].mxu0 }
 0x141   :  { %v476_v34 = vpop.f32.mrb[1].mxu0 }
 0x142   :  { %v477_v36 = vadd.f32 %v476_v34, %v475_v33 }
 0x144   :  { %v478_v37 = vpop.f32.mrb[2].mxu0  ;;  %v217_v38 = vadd.f32 %v477_v36, %v440_v35 }
 0x145   :  { %v479_v39 = vpop.f32.mrb[3].mxu0 }
 0x146   :  { %v480_v40 = vadd.f32 %v479_v39, %v478_v37  ;;  %v219_v41 = vmax.f32 %v217_v38, 0.0 }
 0x148   :  { %v218_v42 = vadd.f32 %v480_v40, %v440_v35  ;;  %549 = vmatprep.mubr.f32.mxu1 %v219_v41 }
 0x14a   :  { %v220_v43 = vmax.f32 %v218_v42, 0.0 }
 0x14c   :  { %550 = vmatmul.mubr.f32.vlgmr.msra.gmra.mrb[0].mxu1 %v220_v43 }
 0x21f   :  { %v551_v48 = vpop.f32.mrb[0].mxu1 }
 0x220   :  { %v316_v49 = vadd.f32 %v551_v48, %v441_v47  ;;  %v310_v50 = vpop.f32.mrb[1].mxu1 }
 0x221   :  { %v311_v51 = vadd.f32 %v441_v47, %v310_v50 }
 0x222   :  { %v320_v53 = vmax.f32 %v316_v49, 0.0 }
 0x223   :  { %v319_v52 = vmax.f32 %v311_v51, 0.0 }
 0x225   :  { %584 = vmatprep.mubr.f32.mxu0 %v319_v52 }
 0x226   :  { %585 = vmatmul.mubr.f32.vlgmr.msra.gmra.mrb[4].mxu0 %v320_v53 }
 0x2f9   :  { %v586_v55 = vpop.f32.mrb[4].mxu0 }
 0x2fa   :  { %v416_v56 = vadd.f32 %v586_v55, %v442_v54  ;;  %v410_v57 = vpop.f32.mrb[5].mxu0 }
 0x2fb   :  { %v411_v58 = vadd.f32 %v442_v54, %v410_v57 }
 0x2fc   :  { %420 = vst [vmem:[#allocation11 + $0x8] sm:$0xff] %v416_v56 }
 0x2fd   :  { %419 = vst [vmem:[#allocation11] sm:$0xff] %v411_v58 }
 0x2fe   :  { %791 = shalt.err (!%p788_p8)
}
 0x2ff   :  { %s792_s6 = scalar_lea.hbm %s954_s7, 256 }
 0x300   :  { %p793_p9 = scmp.ne.s32.totalorder %s954_s7, %s792_s6  ;;  %p796_p10 = scmp.lt.u32.totalorder %s792_s6, %s954_s7 }
 0x302   :  { %p798_p11 = pnand %p796_p10, %p793_p9 }
 0x304   :  { %801 = shalt.err (!%p798_p11)
}
 0x305   :  { %432 = dma.vmem_to_hbm [thread:$0]  %s427_s10, 256, %s954_s7, [#allocation5], %s811_s11, %s811_s11, %s812_s12  }
 0x306   :  { %808 = dma.done.wait [#allocation5], 256  }
 0x307   :  { %809 = vsyncadd [#allocation5], 4294967040 }
 0x308   :  { %436 = vsyncpa [#allocation4], 1 }
 0x309   :  { %437 = vsyncpa [#allocation7], 1 }
 0x30a   :  { %438 = vsyncpa [#allocation10], 1 }
 0x30b   :  { %439 = vsyncpa [#allocation5], 1 }

</bundles_post_ra>
